<compile_context>
chip_gen: v7x
topology: tpu7x:2x2x1
jax: 0.10.0
libtpu: 0.0.40
codegen_flags: <defaults>
</compile_context>

<pallas_src>
import jax
import jax.numpy as jnp
from jax.experimental import pallas as pl
from jax.experimental.pallas import tpu as pltpu


def _round_up(a, m):
    return (a + m - 1) // m * m


def _banded_conv_weight(w, S, E, C):
    """(C, k, E) conv weight -> (S*E, R*C) block-banded matmul weight."""
    k = w.shape[1]
    R = S - k + 1
    wflat = w.reshape(C, k * E).T.astype(jnp.float32)          # (k*E, C)
    big = jnp.zeros((S * E, R * C), jnp.float32)
    for r in range(R):                                         # static, <= S iters
        big = big.at[r * E:(r + k) * E, r * C:(r + 1) * C].set(wflat)
    return big


def global_attention(x, params, *, tb=512):
    """x: (B, S, E) float32.  Returns three arrays of shape (B, C, 1, 1)."""
    B, S, E = x.shape
    watt, batt, w2, b2, w3, b3, w4, b4 = params
    C = w2.shape[0]
    R2, R3, R4 = S - 1, S - 2, S - 3
    n_conv = (R2 + R3 + R4) * C
    ntot = n_conv + 1                    # + 1 gate column
    npad = _round_up(ntot, 128)          # lane-dense matmul output

    # ---- host-side layout plumbing (done once, outside the kernel) ----------
    bigs = [_banded_conv_weight(w, S, E, C) for w in (w2, w3, w4)]
    w_all = jnp.concatenate(
        bigs + [watt.reshape(S * E, 1).astype(jnp.float32)], axis=1)
    w_all = jnp.pad(w_all, ((0, 0), (0, npad - ntot)))          # (S*E, npad)
    b_all = jnp.concatenate([b2, b3, b4], axis=1).astype(jnp.float32)   # (1, 3C)
    batt_s = batt.reshape(1).astype(jnp.float32)                # scalar -> SMEM

    # Batch tiling.  Cap TB so the double-buffered x tile stays <= ~6 MiB,
    # which fits comfortably inside the scoped-VMEM default on every chip.
    row_bytes = S * E * 4
    tb_cap = max(8, (6 << 20) // (2 * row_bytes))
    TB = _round_up(max(8, min(tb, B, tb_cap)), 8)
    B_pad = _round_up(B, TB)
    x2d = x.reshape(B, S * E).astype(jnp.float32)
    if B_pad != B:
        x2d = jnp.pad(x2d, ((0, B_pad - B), (0, 0)))

    gate_col = n_conv
    segments = ((0, R2), (R2 * C, R3), ((R2 + R3) * C, R4))     # (col offset, rows)

    def kernel(x_ref, w_ref, ball_ref, batt_ref, o_ref):
        # One MXU matmul computes the gate logit and all conv rows for TB batches.
        logits = jnp.dot(x_ref[...], w_ref[...],
                         preferred_element_type=jnp.float32)    # (TB, npad)
        score = jax.nn.sigmoid(logits[:, gate_col:gate_col + 1] + batt_ref[0])

        # Max-pool each conv branch over its valid rows (static lane slices),
        # then apply gate/bias/tanh on the tiny (TB, 3C) result.
        pooled = []
        for off, R in segments:
            m = logits[:, off:off + C]
            for r in range(1, R):
                m = jnp.maximum(m, logits[:, off + r * C: off + (r + 1) * C])
            pooled.append(m)
        pooled = jnp.concatenate(pooled, axis=1)                # (TB, 3C)
        o_ref[...] = jnp.tanh(score * pooled + ball_ref[...]).astype(o_ref.dtype)

    # Explicit VMEM budget with headroom (x double-buffer + resident weight +
    # output double-buffer); clamped so it is valid on v5e/v6e/v7x.
    needed = (2 * TB * row_bytes
              + S * E * npad * 4
              + 2 * TB * 3 * C * 4
              + (1 << 16))
    vmem_limit = int(min(max(2 * needed, 16 << 20), 48 << 20))

    out = pl.pallas_call(
        kernel,
        out_shape=jax.ShapeDtypeStruct((B_pad, 3 * C), jnp.float32),
        grid=(B_pad // TB,),
        in_specs=[
            pl.BlockSpec((TB, S * E), lambda i: (i, 0)),        # x (batch tile)
            pl.BlockSpec((S * E, npad), lambda i: (0, 0)),      # fused weights (resident)
            pl.BlockSpec((1, 3 * C), lambda i: (0, 0)),         # conv biases
            pl.BlockSpec(memory_space=pltpu.MemorySpace.SMEM),  # attention bias scalar
        ],
        out_specs=pl.BlockSpec((TB, 3 * C), lambda i: (i, 0)),
        compiler_params=pltpu.CompilerParams(
            dimension_semantics=("parallel",),                  # megacore on v7x
            vmem_limit_bytes=vmem_limit),
    )(x2d, w_all, b_all, batt_s)

    out = out[:B]
    o1 = out[:, 0:C].reshape(B, C, 1, 1)
    o2 = out[:, C:2 * C].reshape(B, C, 1, 1)
    o3 = out[:, 2 * C:3 * C].reshape(B, C, 1, 1)
    return o1, o2, o3


def _reference(x, params):
    """Pure-JAX reference matching the PyTorch forward exactly."""
    watt, batt, w2, b2, w3, b3, w4, b4 = params
    B, S, E = x.shape
    score = jax.nn.sigmoid(jnp.einsum('bse,se->b', x, watt) + batt[0, 0])   # (B,)
    xs = x * score[:, None, None]
    outs = []
    for k, w, b in ((2, w2, b2), (3, w3, b3), (4, w4, b4)):
        C = w.shape[0]
        R = S - k + 1
        acc = jnp.zeros((B, R, C), jnp.float32)
        for dh in range(k):
            acc = acc + jnp.einsum('bre,ce->brc', xs[:, dh:dh + R, :], w[:, dh, :])
        acc = jnp.tanh(acc + b[0][None, None, :])
        outs.append(jnp.max(acc, axis=1).reshape(B, C, 1, 1))
    return tuple(outs)


def _make_params(key, S, E, C):
    ks = jax.random.split(key, 8)
    watt = jax.random.normal(ks[0], (S, E), jnp.float32) * 0.05
    batt = jax.random.normal(ks[1], (1, 1), jnp.float32) * 0.05
    w2 = jax.random.normal(ks[2], (C, 2, E), jnp.float32) * 0.1
    b2 = jax.random.normal(ks[3], (1, C), jnp.float32) * 0.1
    w3 = jax.random.normal(ks[4], (C, 3, E), jnp.float32) * 0.1
    b3 = jax.random.normal(ks[5], (1, C), jnp.float32) * 0.1
    w4 = jax.random.normal(ks[6], (C, 4, E), jnp.float32) * 0.1
    b4 = jax.random.normal(ks[7], (1, C), jnp.float32) * 0.1
    return (watt, batt, w2, b2, w3, b3, w4, b4)


if __name__ == "__main__":
    # Shapes consistent with the module: input_size=8, embed_size=32,
    # out_channels=4.
    S, E, C = 8, 32, 4
    key = jax.random.PRNGKey(0)
    k_x1, k_p1, k_x2, k_p2 = jax.random.split(key, 4)

    # Test 1: B=16 with tb=8 exercises a multi-step batch-tiled grid.
    B = 16
    x = jax.random.normal(k_x1, (B, S, E), jnp.float32)
    params = _make_params(k_p1, S, E, C)
    outs = jax.block_until_ready(global_attention(x, params, tb=8))
    refs = _reference(x, params)
    for o, r in zip(outs, refs):
        assert o.shape == r.shape, (o.shape, r.shape)
        assert jnp.allclose(o, r, atol=1e-5, rtol=1e-4), "mismatch vs reference (test 1)"

    # Test 2: B=64 with the default (auto) tile -> single grid step, larger tile.
    B = 64
    x = jax.random.normal(k_x2, (B, S, E), jnp.float32)
    params = _make_params(k_p2, S, E, C)
    outs = jax.block_until_ready(global_attention(x, params))
    refs = _reference(x, params)
    for o, r in zip(outs, refs):
        assert o.shape == r.shape, (o.shape, r.shape)
        assert jnp.allclose(o, r, atol=1e-5, rtol=1e-4), "mismatch vs reference (test 2)"

    print("KERNEL_OK")
</pallas_src>

<mosaic_0001>
module attributes {stable_mosaic.version = 11 : i64} {
  func.func @kernel(%arg0: i32, %arg1: memref<8x256xf32, #tpu.memory_space<vmem>>, %arg2: memref<256x128xf32, #tpu.memory_space<vmem>>, %arg3: memref<1x12xf32, #tpu.memory_space<vmem>>, %arg4: memref<1xf32, #tpu.memory_space<smem>>, %arg5: memref<8x12xf32, #tpu.memory_space<vmem>>) attributes {dimension_semantics = [#tpu.dimension_semantics<parallel>], iteration_bounds = array<i64: 2>, scalar_prefetch = 0 : i64, scratch_operands = 0 : i64, tpu.core_type = #tpu.core_type<tc>, window_params = [{transform_indices = @transform_0, window_bounds = array<i64: 8, 256>}, {pipeline_mode = #tpu.pipeline_mode<synchronous>, transform_indices = @transform_1, window_bounds = array<i64: 256, 128>}, {pipeline_mode = #tpu.pipeline_mode<synchronous>, transform_indices = @transform_2, window_bounds = array<i64: 1, 12>}, {transform_indices = @transform_3, window_bounds = array<i64: 1>}, {transform_indices = @transform_4, window_bounds = array<i64: 8, 12>}]} {
    %c0 = arith.constant 0 : index
    %c0_0 = arith.constant 0 : index
    %0 = vector.load %arg1[%c0, %c0_0] : memref<8x256xf32, #tpu.memory_space<vmem>>, vector<8x256xf32>
    %c0_1 = arith.constant 0 : index
    %c0_2 = arith.constant 0 : index
    %1 = vector.load %arg2[%c0_1, %c0_2] : memref<256x128xf32, #tpu.memory_space<vmem>>, vector<256x128xf32>
    %cst = arith.constant dense<0.000000e+00> : vector<8x128xf32>
    %2 = tpu.matmul %0, %1, %cst {dimension_numbers = #tpu.dot_dimension_numbers<[1], [0], [0], [1], [0, 0, 1, 1], [], []>} : vector<8x256xf32>, vector<256x128xf32>, vector<8x128xf32> -> vector<8x128xf32>
    %3 = vector.extract_strided_slice %2 {offsets = [0, 72], sizes = [8, 1], strides = [1, 1]} : vector<8x128xf32> to vector<8x1xf32>
    %c0_3 = arith.constant 0 : index
    %4 = memref.load %arg4[%c0_3] : memref<1xf32, #tpu.memory_space<smem>>
    %5 = vector.broadcast %4 : f32 to vector<8x1xf32>
    %6 = arith.addf %3, %5 : vector<8x1xf32>
    %7 = arith.negf %6 : vector<8x1xf32>
    %8 = math.exp %7 : vector<8x1xf32>
    %cst_4 = arith.constant 1.000000e+00 : f32
    %9 = vector.broadcast %cst_4 : f32 to vector<8x1xf32>
    %10 = arith.addf %9, %8 : vector<8x1xf32>
    %11 = arith.divf %9, %10 : vector<8x1xf32>
    %12 = vector.extract_strided_slice %2 {offsets = [0, 0], sizes = [8, 4], strides = [1, 1]} : vector<8x128xf32> to vector<8x4xf32>
    %13 = vector.extract_strided_slice %2 {offsets = [0, 4], sizes = [8, 4], strides = [1, 1]} : vector<8x128xf32> to vector<8x4xf32>
    %14 = arith.maximumf %12, %13 : vector<8x4xf32>
    %15 = vector.extract_strided_slice %2 {offsets = [0, 8], sizes = [8, 4], strides = [1, 1]} : vector<8x128xf32> to vector<8x4xf32>
    %16 = arith.maximumf %14, %15 : vector<8x4xf32>
    %17 = vector.extract_strided_slice %2 {offsets = [0, 12], sizes = [8, 4], strides = [1, 1]} : vector<8x128xf32> to vector<8x4xf32>
    %18 = arith.maximumf %16, %17 : vector<8x4xf32>
    %19 = vector.extract_strided_slice %2 {offsets = [0, 16], sizes = [8, 4], strides = [1, 1]} : vector<8x128xf32> to vector<8x4xf32>
    %20 = arith.maximumf %18, %19 : vector<8x4xf32>
    %21 = vector.extract_strided_slice %2 {offsets = [0, 20], sizes = [8, 4], strides = [1, 1]} : vector<8x128xf32> to vector<8x4xf32>
    %22 = arith.maximumf %20, %21 : vector<8x4xf32>
    %23 = vector.extract_strided_slice %2 {offsets = [0, 24], sizes = [8, 4], strides = [1, 1]} : vector<8x128xf32> to vector<8x4xf32>
    %24 = arith.maximumf %22, %23 : vector<8x4xf32>
    %25 = vector.extract_strided_slice %2 {offsets = [0, 28], sizes = [8, 4], strides = [1, 1]} : vector<8x128xf32> to vector<8x4xf32>
    %26 = vector.extract_strided_slice %2 {offsets = [0, 32], sizes = [8, 4], strides = [1, 1]} : vector<8x128xf32> to vector<8x4xf32>
    %27 = arith.maximumf %25, %26 : vector<8x4xf32>
    %28 = vector.extract_strided_slice %2 {offsets = [0, 36], sizes = [8, 4], strides = [1, 1]} : vector<8x128xf32> to vector<8x4xf32>
    %29 = arith.maximumf %27, %28 : vector<8x4xf32>
    %30 = vector.extract_strided_slice %2 {offsets = [0, 40], sizes = [8, 4], strides = [1, 1]} : vector<8x128xf32> to vector<8x4xf32>
    %31 = arith.maximumf %29, %30 : vector<8x4xf32>
    %32 = vector.extract_strided_slice %2 {offsets = [0, 44], sizes = [8, 4], strides = [1, 1]} : vector<8x128xf32> to vector<8x4xf32>
    %33 = arith.maximumf %31, %32 : vector<8x4xf32>
    %34 = vector.extract_strided_slice %2 {offsets = [0, 48], sizes = [8, 4], strides = [1, 1]} : vector<8x128xf32> to vector<8x4xf32>
    %35 = arith.maximumf %33, %34 : vector<8x4xf32>
    %36 = vector.extract_strided_slice %2 {offsets = [0, 52], sizes = [8, 4], strides = [1, 1]} : vector<8x128xf32> to vector<8x4xf32>
    %37 = vector.extract_strided_slice %2 {offsets = [0, 56], sizes = [8, 4], strides = [1, 1]} : vector<8x128xf32> to vector<8x4xf32>
    %38 = arith.maximumf %36, %37 : vector<8x4xf32>
    %39 = vector.extract_strided_slice %2 {offsets = [0, 60], sizes = [8, 4], strides = [1, 1]} : vector<8x128xf32> to vector<8x4xf32>
    %40 = arith.maximumf %38, %39 : vector<8x4xf32>
    %41 = vector.extract_strided_slice %2 {offsets = [0, 64], sizes = [8, 4], strides = [1, 1]} : vector<8x128xf32> to vector<8x4xf32>
    %42 = arith.maximumf %40, %41 : vector<8x4xf32>
    %43 = vector.extract_strided_slice %2 {offsets = [0, 68], sizes = [8, 4], strides = [1, 1]} : vector<8x128xf32> to vector<8x4xf32>
    %44 = arith.maximumf %42, %43 : vector<8x4xf32>
    %45 = tpu.concatenate %24, %35, %44 in 1 : vector<8x4xf32>, vector<8x4xf32>, vector<8x4xf32> -> vector<8x12xf32>
    %46 = vector.broadcast %11 : vector<8x1xf32> to vector<8x12xf32>
    %47 = arith.mulf %46, %45 : vector<8x12xf32>
    %c0_5 = arith.constant 0 : index
    %c0_6 = arith.constant 0 : index
    %48 = vector.load %arg3[%c0_5, %c0_6] : memref<1x12xf32, #tpu.memory_space<vmem>>, vector<1x12xf32>
    %49 = vector.broadcast %48 : vector<1x12xf32> to vector<8x12xf32>
    %50 = arith.addf %47, %49 : vector<8x12xf32>
    %51 = math.tanh %50 : vector<8x12xf32>
    %c0_7 = arith.constant 0 : index
    %c0_8 = arith.constant 0 : index
    %52 = vector.load %arg5[%c0_7, %c0_8] : memref<8x12xf32, #tpu.memory_space<vmem>>, vector<8x12xf32>
    tpu.vector_store %arg5[%c0_7, %c0_8], %51 {strides = array<i32>} : memref<8x12xf32, #tpu.memory_space<vmem>>, vector<8x12xf32>,
    return
  }
  func.func @transform_0(%arg0: i32) -> (i32, i32) {
    %c0_i32 = arith.constant 0 : i32
    %c0_i32_0 = arith.constant 0 : i32
    return %arg0, %c0_i32 : i32, i32
  }
  func.func @transform_1(%arg0: i32) -> (i32, i32) {
    %c0_i32 = arith.constant 0 : i32
    %c0_i32_0 = arith.constant 0 : i32
    %c0_i32_1 = arith.constant 0 : i32
    return %c0_i32, %c0_i32_0 : i32, i32
  }
  func.func @transform_2(%arg0: i32) -> (i32, i32) {
    %c0_i32 = arith.constant 0 : i32
    %c0_i32_0 = arith.constant 0 : i32
    %c0_i32_1 = arith.constant 0 : i32
    return %c0_i32, %c0_i32_0 : i32, i32
  }
  func.func @transform_3(%arg0: i32) -> i32 {
    %c0_i32 = arith.constant 0 : i32
    %c0_i32_0 = arith.constant 0 : i32
    return %c0_i32 : i32
  }
  func.func @transform_4(%arg0: i32) -> (i32, i32) {
    %c0_i32 = arith.constant 0 : i32
    %c0_i32_0 = arith.constant 0 : i32
    return %arg0, %c0_i32 : i32, i32
  }
}

</mosaic_0001>

<bundles_post_ra>
// kernel: tpu_custom_call.1
= control target key start
LH: loop header
LB: loop body
LE: loop exit
PB: predicated region body
PF: predicated region fallthrough
CT: control target
= control target key end

     0   :  { %s1026_s0 = inlined_call_operand.hbm [shape: f32[16,256], index: 0, kind: input, shape index: {}]   ;;  %s1027_s1 = inlined_call_operand.hbm [shape: f32[256,128], index: 1, kind: input, shape index: {}]   ;;  %s1028_s2 = inlined_call_operand.vmem [shape: f32[1,12], index: 2, kind: input, shape index: {}]   ;;  %s1029_s3 = inlined_call_operand.<no memory space> [shape: f32[1], index: 3, kind: input, shape index: {}]   ;;  %s1030_s4 = inlined_call_operand.hbm [shape: f32[16,12], index: 4, kind: output, shape index: {}]  }
   0x1   :  { %9 = sst [smem:[#allocation2]] %s1029_s3 }
   0x2   :  { %10 = vsyncpa [#allocation4], 0 }
   0x3   :  { %12 = vsyncpa [#allocation4 + $0x1], 0 }
   0x4   :  { %13 = vsyncpa [#allocation7], 0 }
   0x5   :  { %14 = vsyncpa [#allocation5], 0 }
   0x6   :  { %16 = vsyncpa [#allocation5 + $0x1], 0  ;;  %s822_s17 = smov 0   ;;  %s824_s18 = smov 0  }
   0x7   :  { %s826_s19 = smov 0   ;;  %s828_s20 = smov 0  }
   0x8 LB: > { %s843_s3 = sadd.s32 4294967295, %s779_s20   ;;  %s491_s21 = sadd.s32 4294967294, %s779_s20   ;;  %s779_s20 = sphi %s828_s20, %s1050_s20   ;;  %s775_s19 = sphi %s826_s19, %s1049_s19   ;;  %s771_s18 = sphi %s824_s18, %s1048_s18   ;;  %s767_s17 = sphi %s822_s17, %s1047_s17  }
   0x9   : > { %p42_p0 = scmp.ne.s32.totalorder %s771_s18, %s767_s17  ;;  %p1031_p1 = scmp.eq.s32.totalorder %s843_s3, 0 }
   0xa   : > { %p135_p3 = scmp.eq.s32.totalorder %s491_s21, 1  ;;  %p492_p5 = scmp.ge.s32.totalorder %s779_s20, 1 }
   0xb   : > { %p852_p4 = por %p1031_p1, %p42_p0  ;;  %p142_p7 = scmp.lt.s32.totalorder %s779_s20, 3 }
   0xc   : > { %p857_p6 = por %p135_p3, %p42_p0  ;;  %s781_s25 = smov [#allocation6]  }
   0xd   : > { %s1034_s22 = scalar_select %p852_p4, 1, 0 }
   0xe   : > { %s1035_s23 = scalar_select %p857_p6, 1, 0 }
   0xf   : > { %p862_p8 = pnand %p492_p5, %p142_p7  ;;  %s154_s26 = sshll.u32 %s781_s25, 4  ;;  %s866_s26 = int_to_ptr.vmem [resolvable:$true] %s154_s26 }
  0x10   : > { %s878_s28 = sadd.s32 1, %s779_s20   ;;  %s29_s29 = sadd.s32 1, %s775_s19 }
  0x11   : > { %s1036_s24 = scalar_select %p862_p8, 1, 0 }
  0x12   : > { %p584_p9 = pneg %p862_p8  ;;  %s26_s30 = ssub.s32 %s779_s20, %s878_s28 }
  0x13   : > { %s651_s7 = scalar_lea.hbm %s1027_s1, 4096 }
  0x14   : > { %p873_p11 = pnand %p584_p9, %p1031_p1  ;;  %p652_p12 = scmp.ne.s32.totalorder %s1027_s1, %s651_s7 }
  0x15   : > { %p658_p5 = scmp.lt.u32.totalorder %s651_s7, %s1027_s1 }
  0x16   : > { %p653_p13 = pneg %p873_p11 }
  0x18   : > { %p654_p0 = pnand %p653_p13, %p652_p12 }
  0x1a   : > { %p655_p3 = pneg %p654_p0 }
  0x1c   : > { %p660_p7 = pnand %p658_p5, %p655_p3 }
  0x1e   : > { %663 = shalt.err (!%p660_p7)
}
  0x1f   : > { %s664_s12 = scalar_lea.vmem %s866_s26, 4096  ;;  %p672_p2 = scmp.lt.s32.totalorder %s866_s26, %s866_s26 }
  0x20   : > { %p665_p9 = scmp.ne.s32.totalorder %s866_s26, %s664_s12  ;;  %p673_p6 = scmp.lt.s32.totalorder %s664_s12, %s664_s12 }
  0x22   : > { %p667_p10 = pnand %p665_p9, %p653_p13  ;;  %p674_p4 = por %p673_p6, %p672_p2 }
  0x24   : > { %p668_p1 = pneg %p667_p10 }
  0x26   : > { %p675_p8 = pnand %p674_p4, %p668_p1 }
  0x28   : > { %678 = shalt.err (!%p675_p8)
}
  0x29   : > { %s782_s13 = smov 128   ;;  %s783_s14 = smov 8  }
  0x2a   : > { %587 = dma.hbm_to_vmem [thread:$0]  (!%p873_p11), %s1027_s1, 4096, %s866_s26, [#allocation7], %s782_s13, %s782_s13, %s783_s14  }
  0x2b   : > { %p27_p2 = scmp.eq.s32.totalorder %s26_s30, 0  ;;  %p36_p1 = scmp.ne.s32.totalorder %s775_s19, %s771_s18 }
  0x2c   : > { %p37_p4 = scmp.eq.s32.totalorder %s779_s20, 0  ;;  %p597_p6 = scmp.lt.s32.totalorder %s779_s20, 2 }
  0x2d   : > { %s909_s21 = scalar_select %p27_p2, %s775_s19, %s29_s29  }
  0x2e   : > { %p38_p8 = por %p37_p4, %p36_p1  ;;  %p1038_p10 = scmp.eq.s32.totalorder %s843_s3, 1 }
  0x2f   : > { %s174_s5 = sand.u32 1, %s775_s19   ;;  %s508_s6 = sshll.u32 %s779_s20, 8 }
  0x30   : > { %p913_p12 = por %p1038_p10, %p36_p1  ;;  %s495_s7 = sshll.u32 %s174_s5, 4 }
  0x31   : > { %s922_s9 = scalar_lea.hbm %s1026_s0, %s508_s6  ;;  %s178_s26 = scalar_lea.vmem [#allocation3], %s495_s7 }
  0x32   : > { %s186_s29 = sshll.u32 %s178_s26, 4  ;;  %p924_p11 = pnand %p597_p6, %p38_p8  ;;  %s928_s29 = int_to_ptr.vmem [resolvable:$true] %s186_s29 }
  0x33   : > { %s175_s10 = scalar_lea.sflag [#allocation4], %s174_s5  ;;  %s679_s11 = scalar_lea.hbm %s922_s9, 256 }
  0x34   : > { %p680_p13 = scmp.ne.s32.totalorder %s922_s9, %s679_s11  ;;  %p681_p0 = pneg %p924_p11 }
  0x35   : > { %s684_s14 = scalar_lea.hbm %s1026_s0, 512  ;;  %p685_p7 = scmp.lt.u32.totalorder %s922_s9, %s1026_s0 }
  0x36   : > { %p682_p3 = pnand %p681_p0, %p680_p13  ;;  %p686_p9 = scmp.lt.u32.totalorder %s684_s14, %s679_s11 }
  0x37   : > { %p688_p1 = scmp.lt.u32.totalorder %s679_s11, %s922_s9 }
  0x38   : > { %p683_p5 = pneg %p682_p3  ;;  %p687_p2 = por %p686_p9, %p685_p7 }
  0x3a   : > { %p689_p4 = por %p688_p1, %p687_p2 }
  0x3c   : > { %p690_p6 = pnand %p689_p4, %p683_p5 }
  0x3e   : > { %693 = shalt.err (!%p690_p6)
}
  0x3f   : > { %s694_s5 = scalar_lea.vmem %s928_s29, 256  ;;  %s784_s6 = smov [#allocation3]  }
  0x40   : > { %p695_p8 = scmp.ne.s32.totalorder %s928_s29, %s694_s5  ;;  %s699_s7 = sshll.u32 %s784_s6, 4  ;;  %s700_s7 = int_to_ptr.vmem [resolvable:$false] %s699_s7 }
  0x41   : > { %s701_s27 = scalar_lea.vmem %s700_s7, 512  ;;  %p702_p3 = scmp.lt.s32.totalorder %s928_s29, %s700_s7 }
  0x42   : > { %p697_p10 = pnand %p695_p8, %p681_p0  ;;  %p703_p7 = scmp.lt.s32.totalorder %s701_s27, %s694_s5 }
  0x44   : > { %p698_p13 = pneg %p697_p10  ;;  %p704_p9 = por %p703_p7, %p702_p3 }
  0x46   : > { %p705_p2 = pnand %p704_p9, %p698_p13 }
  0x48   : > { %708 = shalt.err (!%p705_p2)
}
  0x49   : > { %591 = dma.hbm_to_vmem [thread:$0]  (!%p924_p11), %s922_s9, 256, %s928_s29, %s175_s10  }
  0x4a   : > { %p1041_p5 = scmp.ne.s32.totalorder %s1036_s24, 0 }
  0x4b   : > { %s958_s8 = sand.u32 (!%p1041_p5), 1, %s771_s18   ;;  %p1042_p0 = scmp.ne.s32.totalorder (!%p1041_p5), %s1034_s22, 0 }
  0x4c   : > { %195 = sbr.rel (%p1041_p5) target bundleno = 610 (0x262), region = 36  ;;  %s499_s26 = sshll.u32 (!%p1041_p5), %s958_s8, 4 }
  0x4d   : > { %s198_s11 = scalar_lea.sflag (!%p1041_p5), [#allocation4], %s958_s8  ;;  %s962_s12 = scalar_lea.vmem (!%p1041_p5), [#allocation3], %s499_s26 }
  0x53   : > { %754 = dma.done.wait (%p1042_p0), %s198_s11, 256  }
  0x54   : > { %756 = vsyncadd (%p1042_p0), %s198_s11, 4294967040  ;;  %p1043_p11 = scmp.eq.s32.totalorder %s843_s3, 0 }
  0x56   : > { %758 = dma.done.wait (%p1043_p11), [#allocation7], 4096   ;;  %p1044_p1 = pmov %p1043_p11 }
  0x57   : > { %v248_v0 = vld [vmem:[#allocation6 + $0x80] sm:$0xff]  ;;  %v249_v1 = vld [vmem:[#allocation6 + $0x88] sm:$0xff]  ;;  %v250_v5 = vld [vmem:[#allocation6 + $0x90] sm:$0xff]  ;;  %v785_v50 = vmov 72   ;;  %s334_s22 = sld [smem:[#allocation2]]  ;;  %s786_s24 = smov 116  }
  0x58   : > { %760 = vsyncadd (%p1044_p1), [#allocation7], 4294963200  ;;  %v232_v2 = vld [vmem:[#allocation6] sm:$0xff]  ;;  %v544_v3 = vpack.c.bf16 %v249_v1, %v248_v0  ;;  %v233_v4 = vld [vmem:[#allocation6 + $0x8] sm:$0xff]  ;;  %643 = vset.pattern.permute.xlu1 %v785_v50  ;;  %644 = vset.pattern.permute.xlu0 %v785_v50  ;;  %s787_s9 = smov 124   ;;  %s788_s29 = smov 112  }
  0x59   : > { %v251_v6 = vld [vmem:[#allocation6 + $0x98] sm:$0xff]  ;;  %v546_v7 = vpack.c.bf16 %v233_v4, %v232_v2  ;;  %v234_v9 = vld [vmem:[#allocation6 + $0x10] sm:$0xff]  ;;  %v252_v11 = vld [vmem:[#allocation6 + $0xa0] sm:$0xff]  ;;  %s789_s30 = smov 120   ;;  %s790_s10 = smov 108   ;;  %vm376_vm0 = vcmask 31744  }
  0x5a   : > { %v548_v8 = vpack.c.bf16 %v251_v6, %v250_v5  ;;  %v235_v10 = vld [vmem:[#allocation6 + $0x18] sm:$0xff]  ;;  %545 = vmatprep.subr.bf16.mxu0 %v544_v3  ;;  %v253_v12 = vld [vmem:[#allocation6 + $0xa8] sm:$0xff]  ;;  %v236_v15 = vld [vmem:[#allocation6 + $0x20] sm:$0xff]  ;;  %s791_s13 = smov 104   ;;  %s792_s14 = smov 84   ;;  %vm378_vm1 = vcmask 64512  }
  0x5b   : > { %547 = vmatpush3.bf16.msra.mxu0 %v546_v7  ;;  %v550_v13 = vpack.c.bf16 %v235_v10, %v234_v9  ;;  %v552_v14 = vpack.c.bf16 %v253_v12, %v252_v11  ;;  %v237_v16 = vld [vmem:[#allocation6 + $0x28] sm:$0xff]  ;;  %v254_v17 = vld [vmem:[#allocation6 + $0xb0] sm:$0xff]  ;;  %v255_v18 = vld [vmem:[#allocation6 + $0xb8] sm:$0xff]  ;;  %s501_s5 = sshll.u32 %s958_s8, 3  ;;  %s505_s6 = sshll.u32 %s843_s3, 7  ;;  %vm395_vm2 = vcmask 97280  }
  0x5c   : > { %549 = vmatprep.subr.bf16.mxu0 %v548_v8  ;;  %v554_v19 = vpack.c.bf16 %v237_v16, %v236_v15  ;;  %v556_v20 = vpack.c.bf16 %v255_v18, %v254_v17  ;;  %v238_v21 = vld [vmem:[#allocation6 + $0x30] sm:$0xff]  ;;  %v239_v22 = vld [vmem:[#allocation6 + $0x38] sm:$0xff]  ;;  %v256_v23 = vld [vmem:[#allocation6 + $0xc0] sm:$0xff]  ;;  %s229_s7 = scalar_lea.vmem [#allocation8], %s501_s5  ;;  %s793_s3 = smov [#allocation8]  }
  0x5d   : > { %v257_v24 = vld [vmem:[#allocation6 + $0xc8] sm:$0xff]  ;;  %v558_v26 = vpack.c.bf16 %v239_v22, %v238_v21  ;;  %v240_v28 = vld [vmem:[#allocation6 + $0x40] sm:$0xff]  ;;  %v258_v30 = vld [vmem:[#allocation6 + $0xd0] sm:$0xff]  ;;  %v335_v53 = vstv %s334_s22  ;;  %s411_s27 = sshll.u32 %s229_s7, 4  ;;  %s398_s22 = scalar_lea.sflag [#allocation5], %s958_s8  ;;  %s984_s27 = int_to_ptr.vmem [resolvable:$true] %s411_s27 }
  0x5e   : > { %v231_v25 = vld [vmem:[%s962_s12 + $0x8] sm:$0xff]  ;;  %v560_v27 = vpack.c.bf16 %v257_v24, %v256_v23  ;;  %v242_v34 = vld [vmem:[#allocation6 + $0x50] sm:$0xff]  ;;  %v260_v36 = vld [vmem:[#allocation6 + $0xe0] sm:$0xff] }
  0x5f   : > { %551 = vmatpush3.bf16.msra.mxu0 %v550_v13  ;;  %328 = vmatprep.mubr.f32.mxu0 %v231_v25  ;;  %v241_v29 = vld [vmem:[#allocation6 + $0x48] sm:$0xff]  ;;  %v259_v31 = vld [vmem:[#allocation6 + $0xd8] sm:$0xff]  ;;  %v244_v40 = vld [vmem:[#allocation6 + $0x60] sm:$0xff] }
  0x60   : > { %553 = vmatprep.subr.bf16.mxu0 %v552_v14  ;;  %v562_v32 = vpack.c.bf16 %v241_v29, %v240_v28  ;;  %v564_v33 = vpack.c.bf16 %v259_v31, %v258_v30  ;;  %v243_v35 = vld [vmem:[#allocation6 + $0x58] sm:$0xff]  ;;  %v261_v37 = vld [vmem:[#allocation6 + $0xe8] sm:$0xff]  ;;  %v262_v42 = vld [vmem:[#allocation6 + $0xf0] sm:$0xff] }
  0x61   : > { %v566_v38 = vpack.c.bf16 %v243_v35, %v242_v34  ;;  %v568_v39 = vpack.c.bf16 %v261_v37, %v260_v36  ;;  %v245_v41 = vld [vmem:[#allocation6 + $0x68] sm:$0xff]  ;;  %v263_v43 = vld [vmem:[#allocation6 + $0xf8] sm:$0xff]  ;;  %v246_v46 = vld [vmem:[#allocation6 + $0x70] sm:$0xff] }
  0x62   : > { %v570_v44 = vpack.c.bf16 %v245_v41, %v244_v40  ;;  %v572_v45 = vpack.c.bf16 %v263_v43, %v262_v42  ;;  %v247_v47 = vld [vmem:[#allocation6 + $0x78] sm:$0xff]  ;;  %v230_v49 = vld [vmem:[%s962_s12] sm:$0xff]  ;;  %s982_s12 = scalar_lea.hbm %s1030_s4, %s505_s6 }
  0x63   : > { %555 = vmatpush3.bf16.msra.mxu0 %v554_v19  ;;  %v574_v48 = vpack.c.bf16 %v247_v47, %v246_v46  ;;  %v503_v12 = vld [vmem:[%s1028_s2] ss:$0 sm:$0xff] }
  0x64   : > { %557 = vmatprep.subr.bf16.mxu0 %v556_v20 }
  0x67   : > { %559 = vmatpush3.bf16.msra.mxu0 %v558_v26 }
  0x68   : > { %561 = vmatprep.subr.bf16.mxu0 %v560_v27 }
  0x6b   : > { %563 = vmatpush3.bf16.msra.mxu0 %v562_v32 }
  0x6c   : > { %565 = vmatprep.subr.bf16.mxu0 %v564_v33 }
  0x6f   : > { %567 = vmatpush3.bf16.msra.mxu0 %v566_v38 }
  0x70   : > { %569 = vmatprep.subr.bf16.mxu0 %v568_v39 }
  0x73   : > { %571 = vmatpush3.bf16.msra.mxu0 %v570_v44 }
  0x74   : > { %573 = vmatprep.subr.bf16.mxu0 %v572_v45 }
  0x77   : > { %575 = vmatpush3.bf16.msra.mxu0 %v574_v48 }
  0x7a   : > { %329 = vmatmul.mubr.f32.vlgmr.msra.gmra.mrb[0].mxu0 %v230_v49 }
 0x14d   : > { %v541_v51 = vpop.f32.mrb[0].mxu0 }
 0x14e   : > { %v542_v52 = vpop.f32.mrb[1].mxu0 }
 0x14f   : > { %v543_v54 = vadd.f32 %v542_v52, %v541_v51 }
 0x151   : > { %352 = vrot.lane.b32.xlu1 %v543_v54, %s786_s24  ;;  %344 = vrot.lane.b32.xlu0 %v543_v54, %s787_s9  ;;  %v336_v55 = vadd.f32 %v543_v54, %v335_v53  ;;  %s709_s24 = scalar_lea.vmem %s984_s27, 128  ;;  %s713_s9 = sshll.u32 %s793_s3, 4  ;;  %s714_s9 = int_to_ptr.vmem [resolvable:$false] %s713_s9 }
 0x152   : > { %p710_p4 = scmp.ne.s32.totalorder %s984_s27, %s709_s24  ;;  %p716_p10 = scmp.lt.s32.totalorder %s984_s27, %s714_s9 }
 0x153   : > { %v502_v56 = vmul.f32 -1.442695, %v336_v55 }
 0x154   : > { %p711_p6 = pnand %p710_p4, %p913_p12 }
 0x155   : > { %356 = vrot.lane.b32.xlu1 %v543_v54, %s788_s29  ;;  %348 = vrot.lane.b32.xlu0 %v543_v54, %s789_s30  ;;  %645 = vpow2.f32 %v502_v56  ;;  %s715_s29 = scalar_lea.vmem %s714_s9, 256 }
 0x156   : > { %p712_p8 = pneg %p711_p6  ;;  %p717_p13 = scmp.lt.s32.totalorder %s715_s29, %s709_s24 }
 0x158   : > { %p718_p3 = por %p717_p13, %p716_p10 }
 0x159   : > { %360 = vrot.lane.b32.xlu0 %v543_v54, %s790_s10 }
 0x15a   : > { %p719_p7 = pnand %p718_p3, %p712_p8 }
 0x15d   : > { %364 = vrot.lane.b32.xlu0 %v543_v54, %s791_s13 }
 0x15f   : > { %v646_v57 = vpop.eup %645 }
 0x160   : > { %v340_v58 = vadd.f32 1.0, %v646_v57 }
 0x162   : > { %647 = vrcp.f32 %v340_v58 }
 0x16c   : > { %v648_v59 = vpop.eup %647 }
 0x16d   : > { %382 = vperm.xlu1 %643, %v648_v59  }
 0x1c3   : > { %v345_v60 = vpop.permute.xlu0 %344  ;;  %v353_v61 = vpop.permute.xlu1 %352 }
 0x1c4   : > { %v347_v62 = vmax.f32 %v543_v54, %v345_v60 }
 0x1c7   : > { %v349_v63 = vpop.permute.xlu0 %348  ;;  %v357_v2 = vpop.permute.xlu1 %356 }
 0x1c8   : > { %v351_v0 = vmax.f32 %v347_v62, %v349_v63 }
 0x1ca   : > { %v355_v1 = vmax.f32 %v351_v0, %v353_v61 }
 0x1cb   : > { %v361_v4 = vpop.permute.xlu0 %360 }
 0x1cc   : > { %v359_v3 = vmax.f32 %v355_v1, %v357_v2 }
 0x1ce   : > { %v363_v5 = vmax.f32 %v359_v3, %v361_v4  ;;  %373 = vrot.lane.b32.xlu0 %v359_v3, %s792_s14 }
 0x1cf   : > { %v365_v6 = vpop.permute.xlu0 %364 }
 0x1d0   : > { %369 = vrot.lane.b32.xlu1 %v363_v5, %s791_s13  ;;  %v367_v8 = vmax.f32 %v363_v5, %v365_v6 }
 0x1ec   : > { %v383_v7 = vpop.permute.xlu1 %382 }
 0x240   : > { %v374_v10 = vpop.permute.xlu0 %373 }
 0x242   : > { %v370_v9 = vpop.permute.xlu1 %369 }
 0x243   : > { %v377_v11 = vsel %vm376_vm0, %v367_v8, %v370_v9 }
 0x244   : > { %v379_v13 = vsel %vm378_vm1, %v377_v11, %v374_v10 }
 0x245   : > { %v385_v14 = vmul.f32 %v383_v7, %v379_v13 }
 0x247   : > { %v393_v15 = vadd.f32 %v503_v12, %v385_v14 }
 0x249   : > { %649 = vtanh.f32 %v393_v15 }
 0x253   : > { %v650_v16 = vpop.eup %649 }
 0x254   : > { %396 = vst.msk [vmem:[%s229_s7] sm:$0xff] %vm395_vm2, %v650_v16 }
 0x255   : > { %722 = shalt.err (!%p719_p7)
}
 0x256   : > { %s723_s8 = scalar_lea.hbm %s982_s12, 128  ;;  %s727_s13 = scalar_lea.hbm %s1030_s4, 256 }
 0x257   : > { %p724_p9 = scmp.ne.s32.totalorder %s982_s12, %s723_s8  ;;  %p728_p0 = scmp.lt.u32.totalorder %s982_s12, %s1030_s4 }
 0x258   : > { %p729_p11 = scmp.lt.u32.totalorder %s727_s13, %s723_s8  ;;  %p731_p4 = scmp.lt.u32.totalorder %s723_s8, %s982_s12 }
 0x259   : > { %p725_p2 = pnand %p724_p9, %p913_p12 }
 0x25a   : > { %p730_p1 = por %p729_p11, %p728_p0 }
 0x25b   : > { %p726_p5 = pneg %p725_p2 }
 0x25c   : > { %p732_p6 = por %p731_p4, %p730_p1 }
 0x25e   : > { %p733_p8 = pnand %p732_p6, %p726_p5 }
 0x260   : > { %736 = shalt.err (!%p733_p8)
}
 0x261   : > { %582 = dma.vmem_to_hbm [thread:$0]  (%p913_p12), %s984_s27, 128, %s982_s12, %s398_s22  }
 0x262 PF: > { %s423_s16 = sand.u32 1, %s767_s17   ;;  %p1045_p10 = scmp.ne.s32.totalorder %s1035_s23, 0 }
 0x263   : > { %p1046_p13 = scmp.ge.s32.totalorder %s779_s20, 2  ;;  %s424_s5 = scalar_lea.sflag [#allocation5], %s423_s16 }
 0x265   : > { %p593_p3 = pnand %p1046_p13, %p1045_p10 }
 0x267   : > { %762 = dma.done.wait (!%p593_p3), %s424_s5, 128  }
 0x268   : > { %764 = vsyncadd (!%p593_p3), %s424_s5, 4294967168  ;;  %p19_p7 = scmp.ge.s32.totalorder %s878_s28, 4   ;;  %s1047_s17 = smov %s771_s18 }
 0x269   : > { %s1048_s18 = smov %s775_s19  ;;  %s1049_s19 = smov %s909_s21 }
 0x26a   : > { %s1050_s20 = smov %s878_s28  ;;  %21 = sbr.rel (!%p19_p7) target bundleno = 8 (0x8), region = 85 }
 0x271   :  { %429 = vsyncpa [#allocation4], 1 }
 0x272   :  { %431 = vsyncpa [#allocation4 + $0x1], 1 }
 0x273   :  { %432 = vsyncpa [#allocation7], 1 }
 0x274   :  { %433 = vsyncpa [#allocation5], 1 }
 0x275   :  { %435 = vsyncpa [#allocation5 + $0x1], 1 }

</bundles_post_ra>
